<compile_context>
chip_gen: v7x
topology: tpu7x:2x2x1
jax: 0.10.0
libtpu: 0.0.40
codegen_flags: <defaults>
</compile_context>

<pallas_src>
import jax
import jax.numpy as jnp
from jax.experimental import pallas as pl
from jax.experimental.pallas import tpu as pltpu


def summarizer_kernel(x_ref, w1_ref, b1_ref, w2_ref, b2_ref, o_ref):
    TB, P, D = x_ref.shape
    K = w2_ref.shape[1]

    # Load the (TB, P, D) f32 block once.
    x_f32 = x_ref[...]

    # Flatten batches for the shared MLP (layout-trivial reshape: the wrapper
    # only fuses batches when P is a multiple of 8 sublanes). Cast MXU inputs
    # to bf16; accumulation stays f32 via preferred_element_type.
    x2 = x_f32.reshape(TB * P, D).astype(jnp.bfloat16)      # (TB*P, D) bf16
    x_bf = x_f32.astype(jnp.bfloat16)                        # (TB, P, D) bf16
    w1 = w1_ref[...].astype(jnp.bfloat16)                    # (D, H) bf16
    w2 = w2_ref[...].astype(jnp.bfloat16)                    # (H, K) bf16

    # --- MLP: Linear(D->H) + ReLU + Linear(H->K), bias add in f32 ---
    h = jnp.dot(x2, w1, preferred_element_type=jnp.float32) + b1_ref[...]
    h = jnp.maximum(h, 0.0)                                  # (TB*P, H) f32
    logits = jnp.dot(h.astype(jnp.bfloat16), w2,
                     preferred_element_type=jnp.float32) + b2_ref[...]
    logits = logits.reshape(TB, P, K)                        # (TB, P, K) f32

    # --- softmax over the token axis P (dim=-2 in PyTorch), f32 math ---
    m = jnp.max(logits, axis=1, keepdims=True)               # (TB, 1, K)
    e = jnp.exp(logits - m)                                  # (TB, P, K)
    denom = jnp.sum(e, axis=1, keepdims=True)                # (TB, 1, K)
    # EUP approx reciprocal + multiply instead of a VPU f32 divide.
    w = e * pl.reciprocal(denom, approx=True)                # (TB, P, K)

    # --- z[b] = w[b]^T @ x[b] : (K, P) @ (P, D) -> (K, D), batched over TB ---
    z = jax.lax.dot_general(
        w.astype(jnp.bfloat16), x_bf,
        dimension_numbers=(((1,), (1,)), ((0,), (0,))),      # contract P, batch TB
        preferred_element_type=jnp.float32,
    )                                                        # (TB, K, D) f32

    o_ref[...] = z.astype(o_ref.dtype)


def _choose_batch_tile(B, P, D, target_bytes=4 << 20):
    """Pick how many batch elements to fuse per grid step."""
    if P % 8 != 0:
        # Keep the in-kernel reshapes layout-trivial (leading-dim squeeze only).
        return 1
    per_batch_bytes = P * D * 4
    tb = max(1, min(B, target_bytes // max(per_batch_bytes, 1)))
    if B >= 2:
        # Keep >=2 grid steps so both v7x TensorCores get work.
        tb = min(tb, B // 2)
    while B % tb != 0:
        tb -= 1
    return max(tb, 1)


def summarizer_forward(x, w1, b1, w2, b2):
    B, P, D = x.shape
    H = w1.shape[1]
    K = w2.shape[1]

    TB = _choose_batch_tile(B, P, D)
    grid = (B // TB,)

    # Scoped-VMEM budget: double-buffered x/out blocks + (double-buffered)
    # weights, with 2x headroom; clamp to [32 MiB, 48 MiB] so it is valid on
    # v5e/v6e (128 MiB) and leaves headroom on v7x (64 MiB per TC).
    x_blk = TB * P * D * 4
    o_blk = TB * K * D * 4
    w_bytes = (D * H + H + H * K + K) * 4
    vmem_needed = 2 * (x_blk + o_blk + w_bytes) * 2
    vmem_limit = int(min(max(vmem_needed, 32 * 1024 * 1024), 48 * 1024 * 1024))

    return pl.pallas_call(
        summarizer_kernel,
        out_shape=jax.ShapeDtypeStruct((B, K, D), x.dtype),
        grid_spec=pltpu.PrefetchScalarGridSpec(
            num_scalar_prefetch=0,
            grid=grid,
            in_specs=[
                pl.BlockSpec((TB, P, D), lambda b: (b, 0, 0)),   # x (TB batches)
                pl.BlockSpec((D, H), lambda b: (0, 0)),          # W1
                pl.BlockSpec((1, H), lambda b: (0, 0)),          # b1
                pl.BlockSpec((H, K), lambda b: (0, 0)),          # W2
                pl.BlockSpec((1, K), lambda b: (0, 0)),          # b2
            ],
            out_specs=pl.BlockSpec((TB, K, D), lambda b: (b, 0, 0)),
        ),
        compiler_params=pltpu.CompilerParams(
            dimension_semantics=("parallel",),
            vmem_limit_bytes=vmem_limit,
        ),
    )(x, w1, b1, w2, b2)


def reference_forward(x, w1, b1, w2, b2):
    # Pure-JAX f32 reference mirroring the PyTorch module exactly.
    h = jnp.maximum(jnp.einsum("bpd,dh->bph", x, w1) + b1, 0.0)
    logits = jnp.einsum("bph,hk->bpk", h, w2) + b2
    weight = jax.nn.softmax(logits, axis=-2)          # softmax over P
    weight = jnp.swapaxes(weight, -1, -2)             # (B, K, P)
    return jnp.einsum("bkp,bpd->bkd", weight, x)


if __name__ == "__main__":
    # Shapes implied by the module: x is (batch, p_tokens, vector_dim).
    B, P = 4, 8
    vector_dim, hidden_size, n_output_tokens = 32, 32, 4

    key = jax.random.PRNGKey(0)
    kx, k1, k2, k3, k4 = jax.random.split(key, 5)

    x = jax.random.normal(kx, (B, P, vector_dim), dtype=jnp.float32)

    # Deterministic parameter init (synthetic; matches Linear shapes).
    w1 = jax.random.normal(k1, (vector_dim, hidden_size), dtype=jnp.float32) * 0.1
    b1 = jax.random.normal(k2, (1, hidden_size), dtype=jnp.float32) * 0.1
    w2 = jax.random.normal(k3, (hidden_size, n_output_tokens), dtype=jnp.float32) * 0.1
    b2 = jax.random.normal(k4, (1, n_output_tokens), dtype=jnp.float32) * 0.1

    z = summarizer_forward(x, w1, b1, w2, b2)
    z = jax.block_until_ready(z)

    z_ref = reference_forward(x, w1, b1, w2, b2)
    assert z.shape == (B, n_output_tokens, vector_dim), z.shape
    # bf16 MXU inputs + approx reciprocal => loosen vs. the f32 reference.
    assert jnp.allclose(z, z_ref, atol=2e-2, rtol=2e-2), (
        float(jnp.max(jnp.abs(z - z_ref)))
    )

    print("KERNEL_OK")
</pallas_src>

<mosaic_0001>
module attributes {stable_mosaic.version = 11 : i64} {
  func.func @summarizer_kernel(%arg0: i32, %arg1: memref<2x8x32xf32, #tpu.memory_space<vmem>>, %arg2: memref<32x32xf32, #tpu.memory_space<vmem>>, %arg3: memref<1x32xf32, #tpu.memory_space<vmem>>, %arg4: memref<32x4xf32, #tpu.memory_space<vmem>>, %arg5: memref<1x4xf32, #tpu.memory_space<vmem>>, %arg6: memref<2x4x32xf32, #tpu.memory_space<vmem>>) attributes {dimension_semantics = [#tpu.dimension_semantics<parallel>], iteration_bounds = array<i64: 2>, scalar_prefetch = 0 : i64, scratch_operands = 0 : i64, tpu.core_type = #tpu.core_type<tc>, window_params = [{transform_indices = @transform_0, window_bounds = array<i64: 2, 8, 32>}, {pipeline_mode = #tpu.pipeline_mode<synchronous>, transform_indices = @transform_1, window_bounds = array<i64: 32, 32>}, {pipeline_mode = #tpu.pipeline_mode<synchronous>, transform_indices = @transform_2, window_bounds = array<i64: 1, 32>}, {pipeline_mode = #tpu.pipeline_mode<synchronous>, transform_indices = @transform_3, window_bounds = array<i64: 32, 4>}, {pipeline_mode = #tpu.pipeline_mode<synchronous>, transform_indices = @transform_4, window_bounds = array<i64: 1, 4>}, {transform_indices = @transform_5, window_bounds = array<i64: 2, 4, 32>}]} {
    %c0 = arith.constant 0 : index
    %c0_0 = arith.constant 0 : index
    %c0_1 = arith.constant 0 : index
    %0 = vector.load %arg1[%c0, %c0_0, %c0_1] : memref<2x8x32xf32, #tpu.memory_space<vmem>>, vector<2x8x32xf32>
    %1 = vector.shape_cast %0 : vector<2x8x32xf32> to vector<16x32xf32>
    %2 = arith.truncf %1 : vector<16x32xf32> to vector<16x32xbf16>
    %3 = arith.truncf %0 : vector<2x8x32xf32> to vector<2x8x32xbf16>
    %c0_2 = arith.constant 0 : index
    %c0_3 = arith.constant 0 : index
    %4 = vector.load %arg2[%c0_2, %c0_3] : memref<32x32xf32, #tpu.memory_space<vmem>>, vector<32x32xf32>
    %5 = arith.truncf %4 : vector<32x32xf32> to vector<32x32xbf16>
    %c0_4 = arith.constant 0 : index
    %c0_5 = arith.constant 0 : index
    %6 = vector.load %arg4[%c0_4, %c0_5] : memref<32x4xf32, #tpu.memory_space<vmem>>, vector<32x4xf32>
    %7 = arith.truncf %6 : vector<32x4xf32> to vector<32x4xbf16>
    %cst = arith.constant dense<0.000000e+00> : vector<16x32xf32>
    %8 = tpu.matmul %2, %5, %cst {dimension_numbers = #tpu.dot_dimension_numbers<[1], [0], [0], [1], [0, 0, 1, 1], [], []>} : vector<16x32xbf16>, vector<32x32xbf16>, vector<16x32xf32> -> vector<16x32xf32>
    %c0_6 = arith.constant 0 : index
    %c0_7 = arith.constant 0 : index
    %9 = vector.load %arg3[%c0_6, %c0_7] : memref<1x32xf32, #tpu.memory_space<vmem>>, vector<1x32xf32>
    %10 = vector.broadcast %9 : vector<1x32xf32> to vector<16x32xf32>
    %11 = arith.addf %8, %10 : vector<16x32xf32>
    %cst_8 = arith.constant 0.000000e+00 : f32
    %12 = vector.broadcast %cst_8 : f32 to vector<16x32xf32>
    %13 = arith.maximumf %11, %12 : vector<16x32xf32>
    %14 = arith.truncf %13 : vector<16x32xf32> to vector<16x32xbf16>
    %cst_9 = arith.constant dense<0.000000e+00> : vector<16x4xf32>
    %15 = tpu.matmul %14, %7, %cst_9 {dimension_numbers = #tpu.dot_dimension_numbers<[1], [0], [0], [1], [0, 0, 1, 1], [], []>} : vector<16x32xbf16>, vector<32x4xbf16>, vector<16x4xf32> -> vector<16x4xf32>
    %c0_10 = arith.constant 0 : index
    %c0_11 = arith.constant 0 : index
    %16 = vector.load %arg5[%c0_10, %c0_11] : memref<1x4xf32, #tpu.memory_space<vmem>>, vector<1x4xf32>
    %17 = vector.broadcast %16 : vector<1x4xf32> to vector<16x4xf32>
    %18 = arith.addf %15, %17 : vector<16x4xf32>
    %19 = vector.shape_cast %18 : vector<16x4xf32> to vector<2x8x4xf32>
    %cst_12 = arith.constant dense<0xFF800000> : vector<2x4xf32>
    %20 = vector.multi_reduction <maximumf>, %19, %cst_12 [1] : vector<2x8x4xf32> to vector<2x4xf32>
    %21 = vector.shape_cast %20 : vector<2x4xf32> to vector<2x1x4xf32>
    %22 = vector.broadcast %21 : vector<2x1x4xf32> to vector<2x8x4xf32>
    %23 = arith.subf %19, %22 : vector<2x8x4xf32>
    %24 = math.exp %23 : vector<2x8x4xf32>
    %cst_13 = arith.constant dense<0.000000e+00> : vector<2x4xf32>
    %25 = vector.multi_reduction <add>, %24, %cst_13 [1] : vector<2x8x4xf32> to vector<2x4xf32>
    %26 = vector.shape_cast %25 : vector<2x4xf32> to vector<2x1x4xf32>
    %27 = tpu.reciprocal %26 {approx = true} : vector<2x1x4xf32> -> vector<2x1x4xf32>
    %28 = vector.broadcast %27 : vector<2x1x4xf32> to vector<2x8x4xf32>
    %29 = arith.mulf %24, %28 : vector<2x8x4xf32>
    %30 = arith.truncf %29 : vector<2x8x4xf32> to vector<2x8x4xbf16>
    %cst_14 = arith.constant dense<0.000000e+00> : vector<2x4x32xf32>
    %31 = tpu.matmul %30, %3, %cst_14 {dimension_numbers = #tpu.dot_dimension_numbers<[1], [1], [2], [2], [0, 0, 0, 2, 1, 2], [0], [0]>} : vector<2x8x4xbf16>, vector<2x8x32xbf16>, vector<2x4x32xf32> -> vector<2x4x32xf32>
    %c0_15 = arith.constant 0 : index
    %c0_16 = arith.constant 0 : index
    %c0_17 = arith.constant 0 : index
    %32 = vector.load %arg6[%c0_15, %c0_16, %c0_17] : memref<2x4x32xf32, #tpu.memory_space<vmem>>, vector<2x4x32xf32>
    tpu.vector_store %arg6[%c0_15, %c0_16, %c0_17], %31 {strides = array<i32>} : memref<2x4x32xf32, #tpu.memory_space<vmem>>, vector<2x4x32xf32>,
    return
  }
  func.func @transform_0(%arg0: i32) -> (i32, i32, i32) {
    %c0_i32 = arith.constant 0 : i32
    %c0_i32_0 = arith.constant 0 : i32
    %c0_i32_1 = arith.constant 0 : i32
    return %arg0, %c0_i32, %c0_i32_0 : i32, i32, i32
  }
  func.func @transform_1(%arg0: i32) -> (i32, i32) {
    %c0_i32 = arith.constant 0 : i32
    %c0_i32_0 = arith.constant 0 : i32
    %c0_i32_1 = arith.constant 0 : i32
    return %c0_i32, %c0_i32_0 : i32, i32
  }
  func.func @transform_2(%arg0: i32) -> (i32, i32) {
    %c0_i32 = arith.constant 0 : i32
    %c0_i32_0 = arith.constant 0 : i32
    %c0_i32_1 = arith.constant 0 : i32
    return %c0_i32, %c0_i32_0 : i32, i32
  }
  func.func @transform_3(%arg0: i32) -> (i32, i32) {
    %c0_i32 = arith.constant 0 : i32
    %c0_i32_0 = arith.constant 0 : i32
    %c0_i32_1 = arith.constant 0 : i32
    return %c0_i32, %c0_i32_0 : i32, i32
  }
  func.func @transform_4(%arg0: i32) -> (i32, i32) {
    %c0_i32 = arith.constant 0 : i32
    %c0_i32_0 = arith.constant 0 : i32
    %c0_i32_1 = arith.constant 0 : i32
    return %c0_i32, %c0_i32_0 : i32, i32
  }
  func.func @transform_5(%arg0: i32) -> (i32, i32, i32) {
    %c0_i32 = arith.constant 0 : i32
    %c0_i32_0 = arith.constant 0 : i32
    %c0_i32_1 = arith.constant 0 : i32
    return %arg0, %c0_i32, %c0_i32_0 : i32, i32, i32
  }
}

</mosaic_0001>

<bundles_post_ra>
// kernel: tpu_custom_call.1
= control target key start
LH: loop header
LB: loop body
LE: loop exit
PB: predicated region body
PF: predicated region fallthrough
CT: control target
= control target key end

     0   :  { %10 = vsyncpa [#allocation3], 0  ;;  %s1046_s0 = inlined_call_operand.vmem [shape: f32[4,8,32], index: 0, kind: input, shape index: {}]   ;;  %s1047_s1 = inlined_call_operand.hbm [shape: f32[32,32], index: 1, kind: input, shape index: {}]   ;;  %s1048_s2 = inlined_call_operand.vmem [shape: f32[1,32], index: 2, kind: input, shape index: {}]   ;;  %s1049_s3 = inlined_call_operand.vmem [shape: f32[32,4], index: 3, kind: input, shape index: {}]   ;;  %s1050_s4 = inlined_call_operand.vmem [shape: f32[1,4], index: 4, kind: input, shape index: {}]   ;;  %s1051_s5 = inlined_call_operand.hbm [shape: f32[4,4,32], index: 5, kind: output, shape index: {}]  }
   0x1   :  { %11 = vsyncpa [#allocation4], 0 }
   0x2   :  { %13 = vsyncpa [#allocation4 + $0x1], 0  ;;  %s881_s18 = smov 0   ;;  %s883_s19 = smov 0  }
   0x3   :  { %s885_s20 = smov 0   ;;  %s887_s21 = smov 0  }
   0x4 LB: > { %s902_s22 = sadd.s32 4294967295, %s841_s21   ;;  %s623_s23 = sadd.s32 4294967294, %s841_s21   ;;  %s841_s21 = sphi %s887_s21, %s1067_s21   ;;  %s837_s20 = sphi %s885_s20, %s1066_s20   ;;  %s833_s19 = sphi %s883_s19, %s1065_s19   ;;  %s829_s18 = sphi %s881_s18, %s1064_s18  }
   0x5   : > { %s906_s24 = sadd.s32 1, %s841_s21   ;;  %s136_s25 = sadd.s32 1, %s837_s20 }
   0x6   : > { %s133_s26 = ssub.s32 %s841_s21, %s906_s24  ;;  %p146_p0 = scmp.ne.s32.totalorder %s837_s20, %s833_s19 }
   0x7   : > { %p134_p1 = scmp.eq.s32.totalorder %s133_s26, 0  ;;  %p147_p2 = scmp.eq.s32.totalorder %s902_s22, 1 }
   0x8   : > { %p152_p3 = scmp.ne.s32.totalorder %s833_s19, %s829_s18  ;;  %p153_p4 = scmp.eq.s32.totalorder %s623_s23, 1 }
   0x9   : > { %s917_s27 = scalar_select %p134_p1, %s837_s20, %s136_s25  }
   0xa   : > { %p919_p5 = por %p147_p2, %p146_p0  ;;  %p923_p6 = por %p153_p4, %p152_p3 }
   0xb   : > { %p624_p7 = scmp.ge.s32.totalorder %s841_s21, 1  ;;  %p160_p8 = scmp.lt.s32.totalorder %s841_s21, 3 }
   0xc   : > { %s1055_s28 = scalar_select %p919_p5, 1, 0 }
   0xd   : > { %s1056_s29 = scalar_select %p923_p6, 1, 0 }
   0xe   : > { %p1052_p9 = scmp.eq.s32.totalorder %s902_s22, 0  ;;  %p930_p10 = pnand %p624_p7, %p160_p8 }
   0xf   : > { %s843_s6 = smov [#allocation2]   ;;  %s747_s11 = scalar_lea.hbm %s1047_s1, 512 }
  0x10   : > { %s1057_s30 = scalar_select %p930_p10, 1, 0 }
  0x11   : > { %s172_s7 = sshll.u32 %s843_s6, 4  ;;  %p688_p11 = pneg %p930_p10  ;;  %s173_s7 = int_to_ptr.vmem [resolvable:$true] %s172_s7 }
  0x12   : > { %p748_p13 = scmp.ne.s32.totalorder %s1047_s1, %s747_s11  ;;  %p754_p3 = scmp.lt.u32.totalorder %s747_s11, %s1047_s1 }
  0x13   : > { %p938_p12 = pnand %p1052_p9, %p688_p11 }
  0x15   : > { %p749_p0 = pneg %p938_p12 }
  0x17   : > { %p750_p1 = pnand %p749_p0, %p748_p13 }
  0x19   : > { %p751_p2 = pneg %p750_p1 }
  0x1b   : > { %p756_p4 = pnand %p754_p3, %p751_p2 }
  0x1d   : > { %759 = shalt.err (!%p756_p4)
}
  0x1e   : > { %s760_s16 = scalar_lea.vmem %s173_s7, 512  ;;  %p768_p9 = scmp.lt.s32.totalorder %s173_s7, %s173_s7 }
  0x1f   : > { %p761_p7 = scmp.ne.s32.totalorder %s173_s7, %s760_s16  ;;  %p769_p6 = scmp.lt.s32.totalorder %s760_s16, %s760_s16 }
  0x21   : > { %p763_p8 = pnand %p761_p7, %p749_p0  ;;  %p770_p5 = por %p769_p6, %p768_p9 }
  0x23   : > { %p764_p11 = pneg %p763_p8 }
  0x25   : > { %p771_p10 = pnand %p770_p5, %p764_p11 }
  0x27   : > { %774 = shalt.err (!%p771_p10)
}
  0x28   : > { %s844_s17 = smov 128   ;;  %s845_s23 = smov 8  }
  0x29   : > { %691 = dma.hbm_to_vmem [thread:$0]  (!%p938_p12), %s1047_s1, 512, %s173_s7, [#allocation3], %s844_s17, %s844_s17, %s845_s23  }
  0x2a   : > { %p1059_p13 = scmp.ne.s32.totalorder %s1057_s30, 0 }
  0x2b   : > { %p1060_p1 = scmp.eq.s32.totalorder (!%p1059_p13), %s902_s22, 0 }
  0x2c   : > { %206 = sbr.rel (%p1059_p13) target bundleno = 887 (0x377), region = 40 }
  0x33   : > { %820 = dma.done.wait (%p1060_p1), [#allocation3], 512   ;;  %p1061_p0 = pmov %p1060_p1 }
  0x34   : > { %s630_s6 = sshll.u32 %s902_s22, 1  ;;  %v846_v0 = vmov 0.0   ;;  %vm847_vm0 = vmmov 0   ;;  %v247_v1 = vld [vmem:[#allocation2] sm:$0xff]  ;;  %v248_v2 = vld [vmem:[#allocation2 + $0x8] sm:$0xff]  ;;  %v249_v3 = vld [vmem:[#allocation2 + $0x10] sm:$0xff] }
  0x35   : > { %822 = vsyncadd (%p1061_p0), [#allocation3], 4294966784  ;;  %654 = vmatprep.subr.bf16.mxu0 %v846_v0  ;;  %658 = vmatprep.mubr.msk.bf16.mxu0 %vm847_vm0, %v846_v0  ;;  %p235_p5 = scmp.lt.s32.totalorder %s630_s6, 3  ;;  %v251_v4 = vpack.c.bf16 %v248_v2, %v247_v1  ;;  %v250_v5 = vld [vmem:[#allocation2 + $0x18] sm:$0xff]  ;;  %vm266_vm1 = vcmask 261120   ;;  %v253_v10 = vld [vmem:[%s1049_s3] sm:$0xff] }
  0x36   : > { %662 = vmatprep.subr.bf16.mxu1 %v846_v0  ;;  %666 = vmatprep.mubr.msk.bf16.mxu1 %vm847_vm0, %v846_v0  ;;  %v252_v6 = vpack.c.bf16 %v250_v5, %v249_v3  ;;  %v254_v11 = vld [vmem:[%s1049_s3 + $0x8] sm:$0xff]  ;;  %v255_v13 = vld [vmem:[%s1049_s3 + $0x10] sm:$0xff]  ;;  %v256_v14 = vld [vmem:[%s1049_s3 + $0x18] sm:$0xff]  ;;  %vm426_vm2 = vcmask 1043456   ;;  %vm365_vm3 = vcmask 31744   ;;  %vm422_vm4 = vcmask 64512  }
  0x37   : > { %s1069_s6 = smov (!%p235_p5, %s630_s6), 3  ;;  %655 = vmatpush3.bf16.msra.mxu0 %v251_v4  ;;  %v257_v12 = vpack.c.bf16 %v254_v11, %v253_v10  ;;  %v258_v15 = vpack.c.bf16 %v256_v14, %v255_v13  ;;  %v632_v16 = vld [vmem:[%s1048_s2] ss:$0 sm:$0xff]  ;;  %vm532_vm5 = vcmask 257024   ;;  %s643_s10 = sshll.u32 %s902_s22, 7 }
  0x38   : > { %s631_s30 = sshll.u32 %s1069_s6, 3  ;;  %656 = vmatprep.subr.bf16.mxu0 %v846_v0  ;;  %v634_v30 = vld [vmem:[%s1050_s4] ss:$0 sm:$0xff]  ;;  %s1003_s13 = scalar_lea.hbm %s1051_s5, %s643_s10 }
  0x39   : > { %s238_s9 = scalar_lea.vmem %s1046_s0, %s631_s30  ;;  %663 = vmatpush3.bf16.msra.mxu1 %v257_v12  ;;  %s231_s30 = sand.u32 1, %s833_s19  }
  0x3a   : > { %v242_v7 = vld [vmem:[%s238_s9] sm:$0xff]  ;;  %v243_v8 = vld [vmem:[%s238_s9 + $0x8] sm:$0xff]  ;;  %664 = vmatprep.subr.bf16.mxu1 %v846_v0  ;;  %s629_s7 = sshll.u32 %s231_s30, 3  ;;  %s1005_s22 = scalar_lea.sflag [#allocation4], %s231_s30 }
  0x3b   : > { %v244_v9 = vpack.c.bf16 %v243_v8, %v242_v7  ;;  %657 = vmatpush3.bf16.msra.mxu0 %v252_v6  ;;  %v245_v26 = vpack.c.bf16 %v242_v7, %v242_v7  ;;  %v246_v27 = vpack.c.bf16 %v243_v8, %v243_v8  ;;  %s233_s8 = scalar_lea.vmem [#allocation5], %s629_s7  ;;  %p1062_p9 = scmp.ne.s32.totalorder %s1055_s28, 0 }
  0x3c   : > { %670 = vmatprep.subr.bf16.mxu0 %v846_v0  ;;  %s549_s9 = sshll.u32 %s233_s8, 4  ;;  %s848_s15 = smov [#allocation5]   ;;  %s998_s9 = int_to_ptr.vmem [resolvable:$true] %s549_s9 }
  0x3d   : > { %665 = vmatpush3.bf16.msra.mxu1 %v258_v15  ;;  %v428_v28 = vsel %vm426_vm2, %v245_v26, 0  ;;  %v490_v29 = vsel %vm426_vm2, %v246_v27, 0  ;;  %s775_s14 = scalar_lea.vmem %s998_s9, 128  ;;  %s779_s16 = sshll.u32 %s848_s15, 4  ;;  %s780_s16 = int_to_ptr.vmem [resolvable:$false] %s779_s16 }
  0x3e   : > { %659 = vmatmul.mubr.msk.bf16.vlgmr.msra.gmra.mrb[0].mxu0 %vm266_vm1, %v244_v9  ;;  %676 = vmatprep.subr.bf16.mxu1 %v846_v0  ;;  %p776_p6 = scmp.ne.s32.totalorder %s998_s9, %s775_s14  ;;  %s781_s17 = scalar_lea.vmem %s780_s16, 256 }
  0x3f   : > { %672 = vmatprep.mubr.msk.bf16.mxu0 %vm847_vm0, %v846_v0  ;;  %671 = vmatpush3.bf16.msra.mxu0 %v428_v28  ;;  %p782_p2 = scmp.lt.s32.totalorder %s998_s9, %s780_s16  ;;  %p783_p3 = scmp.lt.s32.totalorder %s781_s17, %s775_s14 }
  0x40   : > { %p777_p10 = pnand %p776_p6, %p1062_p9 }
  0x41   : > { %p784_p4 = por %p783_p3, %p782_p2 }
  0x42   : > { %p778_p12 = pneg %p777_p10 }
  0x44   : > { %p785_p7 = pnand %p784_p4, %p778_p12 }
 0x111   : > { %v304_v17 = vpop.f32.mrb[0].mxu0 }
 0x112   : > { %v305_v18 = vadd.f32 %v632_v16, %v304_v17  ;;  %v660_v19 = vpop.f32.mrb[1].mxu0 }
 0x113   : > { %v307_v20 = vpop.f32.mrb[2].mxu0 }
 0x114   : > { %v308_v21 = vadd.f32 %v632_v16, %v307_v20  ;;  %v661_v22 = vpop.f32.mrb[3].mxu0  ;;  %v311_v23 = vmax.f32 %v305_v18, 0.0 }
 0x116   : > { %v312_v24 = vmax.f32 %v308_v21, 0.0 }
 0x118   : > { %v313_v25 = vpack.c.bf16 %v312_v24, %v311_v23 }
 0x11a   : > { %667 = vmatmul.mubr.msk.bf16.vlgmr.msra.gmra.mrb[0].mxu1 %vm266_vm1, %v313_v25 }
 0x11b   : > { %678 = vmatprep.mubr.msk.bf16.mxu1 %vm847_vm0, %v846_v0  ;;  %677 = vmatpush3.bf16.msra.mxu1 %v490_v29 }
 0x1ed   : > { %v358_v31 = vpop.f32.mrb[0].mxu1 }
 0x1ee   : > { %v359_v32 = vadd.f32 %v634_v30, %v358_v31  ;;  %v668_v33 = vpop.f32.mrb[1].mxu1 }
 0x1ef   : > { %v361_v34 = vpop.f32.mrb[2].mxu1 }
 0x1f0   : > { %v366_v35 = vsel %vm365_vm3, %v359_v32, -inf  ;;  %v362_v36 = vadd.f32 %v634_v30, %v361_v34  ;;  %v669_v37 = vpop.f32.mrb[3].mxu1 }
 0x1f1   : > { %v367_v38 = vrot.slane %v366_v35, 4 }
 0x1f2   : > { %v373_v39 = vsel %vm365_vm3, %v362_v36, -inf }
 0x1f3   : > { %v368_v40 = vmax.f32 %v366_v35, %v367_v38  ;;  %v374_v41 = vrot.slane %v373_v39, 4 }
 0x1f5   : > { %v369_v42 = vrot.slane %v368_v40, 2  ;;  %v375_v43 = vmax.f32 %v373_v39, %v374_v41 }
 0x1f7   : > { %v370_v44 = vmax.f32 %v368_v40, %v369_v42  ;;  %v376_v45 = vrot.slane %v375_v43, 2 }
 0x1f9   : > { %v371_v46 = vrot.slane %v370_v44, 1  ;;  %v377_v47 = vmax.f32 %v375_v43, %v376_v45 }
 0x1fb   : > { %v372_v48 = vmax.f32 %v370_v44, %v371_v46  ;;  %v378_v49 = vrot.slane %v377_v47, 1 }
 0x1fd   : > { %v380_v50 = vsub.f32 %v359_v32, %v372_v48  ;;  %v379_v51 = vmax.f32 %v377_v47, %v378_v49 }
 0x1ff   : > { %v382_v52 = vmul.f32 1.442695, %v380_v50  ;;  %v381_v53 = vsub.f32 %v362_v36, %v379_v51 }
 0x201   : > { %739 = vpow2.f32 %v382_v52  ;;  %v384_v54 = vmul.f32 1.442695, %v381_v53 }
 0x203   : > { %741 = vpow2.f32 %v384_v54 }
 0x20b   : > { %v740_v55 = vpop.eup %739 }
 0x20c   : > { %v386_v56 = vsel %vm365_vm3, %v740_v55, 0.0 }
 0x20d   : > { %v742_v57 = vpop.eup %741  ;;  %v387_v58 = vrot.slane %v386_v56, 4 }
 0x20e   : > { %v393_v59 = vsel %vm365_vm3, %v742_v57, 0.0 }
 0x20f   : > { %v388_v60 = vadd.f32 %v387_v58, %v386_v56  ;;  %v394_v61 = vrot.slane %v393_v59, 4 }
 0x211   : > { %v389_v62 = vrot.slane %v388_v60, 2  ;;  %v395_v63 = vadd.f32 %v394_v61, %v393_v59 }
 0x213   : > { %v390_v0 = vadd.f32 %v389_v62, %v388_v60  ;;  %v396_v1 = vrot.slane %v395_v63, 2 }
 0x215   : > { %v391_v2 = vrot.slane %v390_v0, 1  ;;  %v397_v3 = vadd.f32 %v396_v1, %v395_v63 }
 0x217   : > { %v392_v4 = vadd.f32 %v391_v2, %v390_v0  ;;  %v398_v5 = vrot.slane %v397_v3, 1 }
 0x219   : > { %743 = vrcp.f32 %v392_v4  ;;  %v399_v6 = vadd.f32 %v398_v5, %v397_v3 }
 0x21b   : > { %745 = vrcp.f32 %v399_v6 }
 0x223   : > { %v744_v7 = vpop.eup %743 }
 0x224   : > { %v402_v8 = vmul.f32 %v744_v7, %v740_v55 }
 0x225   : > { %v746_v9 = vpop.eup %745 }
 0x226   : > { %v404_v10 = vpack.c.bf16 %v402_v8, %v402_v8  ;;  %v403_v11 = vmul.f32 %v746_v9, %v742_v57 }
 0x228   : > { %406 = vxpose.xlu0.c.b16.start.end [1/1] (short) (narrow) %v404_v10, 16  ;;  %v405_v12 = vpack.c.bf16 %v403_v11, %v403_v11 }
 0x22c   : > { %470 = vxpose.xlu0.c.b16.start.end [1/1] (short) (narrow) %v405_v12, 16 }
 0x28e   : > { %v414_v13 = vpop.trf.xlu0 }
 0x28f   : > { %673 = vmatmul.mubr.msk.bf16.vlgmr.msra.gmra.mrb[4].mxu0 %vm422_vm4, %v414_v13 }
 0x292   : > { %v478_v14 = vpop.trf.xlu0 }
 0x293   : > { %679 = vmatmul.mubr.msk.bf16.vlgmr.msra.gmra.mrb[4].mxu1 %vm422_vm4, %v478_v14 }
 0x362   : > { %v464_v15 = vpop.f32.mrb[4].mxu0 }
 0x363   : > { %533 = vst.msk [vmem:[%s233_s8] sm:$0xf] %vm532_vm5, %v464_v15  ;;  %v674_v16 = vpop.f32.mrb[5].mxu0 }
 0x364   : > { %v467_v17 = vpop.f32.mrb[6].mxu0 }
 0x365   : > { %v675_v18 = vpop.f32.mrb[7].mxu0 }
 0x366   : > { %v526_v19 = vpop.f32.mrb[4].mxu1 }
 0x367   : > { %534 = vst.msk [vmem:[%s233_s8 + $0x4] sm:$0xf] %vm532_vm5, %v526_v19  ;;  %v680_v20 = vpop.f32.mrb[5].mxu1 }
 0x368   : > { %v529_v21 = vpop.f32.mrb[6].mxu1 }
 0x369   : > { %788 = shalt.err (!%p785_p7)
}
 0x36a   : > { %s789_s23 = scalar_lea.hbm %s1003_s13, 128  ;;  %s793_s6 = scalar_lea.hbm %s1051_s5, 256 }
 0x36b   : > { %p790_p8 = scmp.ne.s32.totalorder %s1003_s13, %s789_s23  ;;  %p794_p1 = scmp.lt.u32.totalorder %s1003_s13, %s1051_s5 }
 0x36c   : > { %p795_p0 = scmp.lt.u32.totalorder %s793_s6, %s789_s23  ;;  %p797_p6 = scmp.lt.u32.totalorder %s789_s23, %s1003_s13 }
 0x36d   : > { %p791_p11 = pnand %p790_p8, %p1062_p9 }
 0x36e   : > { %p796_p5 = por %p795_p0, %p794_p1 }
 0x36f   : > { %p792_p13 = pneg %p791_p11 }
 0x370   : > { %p798_p10 = por %p797_p6, %p796_p5 }
 0x372   : > { %p799_p12 = pnand %p798_p10, %p792_p13 }
 0x374   : > { %802 = shalt.err (!%p799_p12)
}
 0x375   : > { %s849_s8 = smov 64   ;;  %s850_s10 = smov 4   ;;  %v681_v22 = vpop.f32.mrb[7].mxu1 }
 0x376   : > { %686 = dma.vmem_to_hbm [thread:$0]  (%p1062_p9), %s998_s9, 128, %s1003_s13, %s1005_s22, %s849_s8, %s849_s8, %s850_s10  }
 0x377 PF: > { %p698_p2 = scmp.ge.s32.totalorder %s841_s21, 2  ;;  %s564_s11 = sand.u32 1, %s829_s18  }
 0x378   : > { %p1063_p3 = scmp.ne.s32.totalorder %s1056_s29, 0  ;;  %s565_s12 = scalar_lea.sflag [#allocation4], %s564_s11 }
 0x37a   : > { %p693_p4 = pnand %p698_p2, %p1063_p3 }
 0x37c   : > { %824 = dma.done.wait (!%p693_p4), %s565_s12, 128  }
 0x37d   : > { %826 = vsyncadd (!%p693_p4), %s565_s12, 4294967168  ;;  %p16_p7 = scmp.ge.s32.totalorder %s906_s24, 4   ;;  %s1064_s18 = smov %s833_s19 }
 0x37e   : > { %s1065_s19 = smov %s837_s20  ;;  %s1066_s20 = smov %s917_s27 }
 0x37f   : > { %s1067_s21 = smov %s906_s24  ;;  %18 = sbr.rel (!%p16_p7) target bundleno = 4 (0x4), region = 80 }
 0x386   :  { %570 = vsyncpa [#allocation3], 1 }
 0x387   :  { %572 = vsyncpa [#allocation3 + $0x1], 1 }
 0x388   :  { %573 = vsyncpa [#allocation4], 1 }
 0x389   :  { %575 = vsyncpa [#allocation4 + $0x1], 1 }

</bundles_post_ra>
